<compile_context>
chip_gen: v5e
topology: v5e:2x2
jax: 0.10.0
libtpu: 0.0.40
codegen_flags: <defaults>
</compile_context>

<pallas_src>
import jax
import jax.numpy as jnp
from jax.experimental import pallas as pl
from jax.experimental.pallas import tpu as pltpu


def _round_up(x, m):
    return (x + m - 1) // m * m


def user_feature_kernel(x_ref, w12_ref, b12_ref, w3_ref, b3_ref, out_ref):
    # GEMM1: fused block-diagonal branch Linears -> concatenated hidden.
    # bf16 MXU operands, f32 accumulation / bias / ReLU (v5e-safe).
    h = jnp.dot(x_ref[...], w12_ref[...], preferred_element_type=jnp.float32)
    h = jnp.maximum(h + b12_ref[...], 0.0)

    # GEMM2: combine Linear (4E -> 256 padded) + ReLU, stored as bf16.
    out = jnp.dot(h.astype(w3_ref.dtype), w3_ref[...],
                  preferred_element_type=jnp.float32)
    out_ref[...] = jnp.maximum(out + b3_ref[...], 0.0).astype(out_ref.dtype)


def user_feature_forward(user_id, user_gender, user_age, user_job, params,
                         *, tile_m=1024):
    # Embedding gathers as XLA glue (single small producer fusion).
    e_id = jnp.take(params["id_table"], user_id, axis=0)
    e_g = jnp.take(params["gender_table"], user_gender, axis=0)
    e_a = jnp.take(params["age_table"], user_age, axis=0)
    e_j = jnp.take(params["job_table"], user_job, axis=0)

    # Concatenated branch input, bf16 for the MXU.  K stays at its natural size
    # (no lane padding) -- Mosaic handles the MXU contraction padding internally.
    x = jnp.concatenate([e_id, e_g, e_a, e_j], axis=1).astype(jnp.bfloat16)

    B, k = x.shape
    hid = params["w12"].shape[1]         # 4 * embed_dim
    out_pad = params["w3"].shape[1]      # 256 (200 padded, lane-dense)
    out_dim = params["out_dim"]          # 200

    # Tile selection: choose the number of tiles first so batch over-padding is
    # bounded by n_tiles * 8 rows; force >= 2 tiles when the padded batch allows
    # so the "parallel" axis spans both v7x TensorCores (no-op on v5e/v6e).
    n_tiles = pl.cdiv(B, tile_m)
    if n_tiles < 2 and _round_up(B, 8) >= 16:
        n_tiles = 2
    tm = _round_up(pl.cdiv(B, n_tiles), 8)
    b_pad = n_tiles * tm
    if b_pad != B:
        x = jnp.pad(x, ((0, b_pad - B), (0, 0)))   # batch padding only (often a no-op)

    flops = 2 * b_pad * (k * hid + hid * out_pad)
    bytes_accessed = (b_pad * k * 2                              # bf16 activations in
                      + params["w12"].size * 2 + params["w3"].size * 2
                      + b_pad * out_pad * 2                      # bf16 output
                      + (hid + out_pad) * 4)                     # f32 biases

    out = pl.pallas_call(
        user_feature_kernel,
        out_shape=jax.ShapeDtypeStruct((b_pad, out_pad), jnp.bfloat16),
        grid=(n_tiles,),
        in_specs=[
            pl.BlockSpec((tm, k), lambda i: (i, 0)),           # activations: tiled over batch
            pl.BlockSpec((k, hid), lambda i: (0, 0)),          # block-diag branch weight (resident)
            pl.BlockSpec((1, hid), lambda i: (0, 0)),          # branch bias (resident, f32)
            pl.BlockSpec((hid, out_pad), lambda i: (0, 0)),    # combine weight (resident)
            pl.BlockSpec((1, out_pad), lambda i: (0, 0)),      # combine bias (resident, f32)
        ],
        out_specs=pl.BlockSpec((tm, out_pad), lambda i: (i, 0)),
        compiler_params=pltpu.CompilerParams(
            dimension_semantics=("parallel",)),
        cost_estimate=pl.CostEstimate(
            flops=flops, transcendentals=0, bytes_accessed=bytes_accessed),
    )(x, params["w12"], params["b12"], params["w3"], params["b3"])

    # Padded rows (garbage) and padded lanes (zeros) are dropped here; when
    # b_pad == B this is a lane-only slice.  Output dtype is bf16.
    return out[:B, :out_dim]


def init_params(key, user_id_count, gender_count, age_count, job_count,
                embed_dim, out_dim=200):
    # bf16 sublane packing assumption for the block-diag weight / activations.
    assert embed_dim % 16 == 0, "embed_dim must be a multiple of 16"
    half = embed_dim // 2
    ks = jax.random.split(key, 14)
    s = 0.05

    def rnd(k, shape):
        return s * jax.random.normal(k, shape, jnp.float32)

    id_table = rnd(ks[0], (user_id_count, embed_dim))
    gender_table = rnd(ks[1], (gender_count, half))
    age_table = rnd(ks[2], (age_count, half))
    job_table = rnd(ks[3], (job_count, half))

    w_id = rnd(ks[4], (embed_dim, embed_dim)); b_id = rnd(ks[5], (embed_dim,))
    w_g = rnd(ks[6], (half, embed_dim));       b_g = rnd(ks[7], (embed_dim,))
    w_a = rnd(ks[8], (half, embed_dim));       b_a = rnd(ks[9], (embed_dim,))
    w_j = rnd(ks[10], (half, embed_dim));      b_j = rnd(ks[11], (embed_dim,))

    w3 = rnd(ks[12], (4 * embed_dim, out_dim))
    b3 = rnd(ks[13], (out_dim,))

    k1 = embed_dim + 3 * half                  # natural contraction dim (no padding)
    hid = 4 * embed_dim
    out_pad = _round_up(out_dim, 128)

    # Block-diagonal packing of the four branch weights (fuses the concat).
    w12 = jnp.zeros((k1, hid), jnp.float32)
    w12 = w12.at[0:embed_dim, 0:embed_dim].set(w_id)
    o = embed_dim
    w12 = w12.at[o:o + half, embed_dim:2 * embed_dim].set(w_g); o += half
    w12 = w12.at[o:o + half, 2 * embed_dim:3 * embed_dim].set(w_a); o += half
    w12 = w12.at[o:o + half, 3 * embed_dim:4 * embed_dim].set(w_j)
    b12 = jnp.concatenate([b_id, b_g, b_a, b_j]).reshape(1, hid)

    # Lane-dense (256-wide) combine weight / bias; extra columns are zero.
    w3_pad = jnp.zeros((hid, out_pad), jnp.float32).at[:, :out_dim].set(w3)
    b3_pad = jnp.zeros((1, out_pad), jnp.float32).at[0, :out_dim].set(b3)

    return {
        "id_table": id_table, "gender_table": gender_table,
        "age_table": age_table, "job_table": job_table,
        "w12": w12.astype(jnp.bfloat16), "b12": b12,
        "w3": w3_pad.astype(jnp.bfloat16), "b3": b3_pad,
        "out_dim": out_dim,
        # unpadded f32 originals for the pure-JAX reference
        "ref": dict(w_id=w_id, b_id=b_id, w_g=w_g, b_g=b_g, w_a=w_a, b_a=b_a,
                    w_j=w_j, b_j=b_j, w3=w3, b3=b3),
    }


def reference_forward(user_id, user_gender, user_age, user_job, params):
    """Pure-JAX f32 reference matching the PyTorch forward (eval mode)."""
    r = params["ref"]
    e_id = jnp.take(params["id_table"], user_id, axis=0)
    e_g = jnp.take(params["gender_table"], user_gender, axis=0)
    e_a = jnp.take(params["age_table"], user_age, axis=0)
    e_j = jnp.take(params["job_table"], user_job, axis=0)
    h_id = jax.nn.relu(e_id @ r["w_id"] + r["b_id"])
    h_g = jax.nn.relu(e_g @ r["w_g"] + r["b_g"])
    h_a = jax.nn.relu(e_a @ r["w_a"] + r["b_a"])
    h_j = jax.nn.relu(e_j @ r["w_j"] + r["b_j"])
    comb = jnp.concatenate([h_id, h_g, h_a, h_j], axis=1)
    return jax.nn.relu(comb @ r["w3"] + r["b3"])


if __name__ == "__main__":
    key = jax.random.PRNGKey(0)
    kp, k1, k2, k3, k4 = jax.random.split(key, 5)

    # Small shapes consistent with the module.
    B = 8
    user_id_count, gender_count, age_count, job_count = 64, 2, 7, 21
    embed_dim = 32

    params = init_params(kp, user_id_count, gender_count, age_count, job_count,
                         embed_dim)

    user_id = jax.random.randint(k1, (B,), 0, user_id_count, dtype=jnp.int32)
    user_gender = jax.random.randint(k2, (B,), 0, gender_count, dtype=jnp.int32)
    user_age = jax.random.randint(k3, (B,), 0, age_count, dtype=jnp.int32)
    user_job = jax.random.randint(k4, (B,), 0, job_count, dtype=jnp.int32)

    out = user_feature_forward(user_id, user_gender, user_age, user_job, params)
    out = jax.block_until_ready(out)

    ref = reference_forward(user_id, user_gender, user_age, user_job, params)
    assert out.shape == (B, 200), out.shape
    # bf16 MXU operands and bf16 output (f32 accumulation) -> tolerance looser
    # than pure-f32; document this if the consumer is precision-sensitive.
    out_f32 = out.astype(jnp.float32)
    max_err = float(jnp.max(jnp.abs(out_f32 - ref)))
    assert jnp.allclose(out_f32, ref, atol=2e-2, rtol=2e-2), \
        f"mismatch, max_err={max_err}"

    print("KERNEL_OK")
</pallas_src>

<mosaic_0001>
module attributes {stable_mosaic.version = 11 : i64} {
  func.func @user_feature_kernel(%arg0: i32, %arg1: memref<8x80xbf16, #tpu.memory_space<vmem>>, %arg2: memref<80x128xbf16, #tpu.memory_space<vmem>>, %arg3: memref<1x128xf32, #tpu.memory_space<vmem>>, %arg4: memref<128x256xbf16, #tpu.memory_space<vmem>>, %arg5: memref<1x256xf32, #tpu.memory_space<vmem>>, %arg6: memref<8x256xbf16, #tpu.memory_space<vmem>>) attributes {dimension_semantics = [#tpu.dimension_semantics<parallel>], iteration_bounds = array<i64: 1>, scalar_prefetch = 0 : i64, scratch_operands = 0 : i64, tpu.core_type = #tpu.core_type<tc>, window_params = [{transform_indices = @transform_0, window_bounds = array<i64: 8, 80>}, {pipeline_mode = #tpu.pipeline_mode<synchronous>, transform_indices = @transform_1, window_bounds = array<i64: 80, 128>}, {pipeline_mode = #tpu.pipeline_mode<synchronous>, transform_indices = @transform_2, window_bounds = array<i64: 1, 128>}, {pipeline_mode = #tpu.pipeline_mode<synchronous>, transform_indices = @transform_3, window_bounds = array<i64: 128, 256>}, {pipeline_mode = #tpu.pipeline_mode<synchronous>, transform_indices = @transform_4, window_bounds = array<i64: 1, 256>}, {transform_indices = @transform_5, window_bounds = array<i64: 8, 256>}]} {
    %c0 = arith.constant 0 : index
    %c0_0 = arith.constant 0 : index
    %0 = vector.load %arg1[%c0, %c0_0] : memref<8x80xbf16, #tpu.memory_space<vmem>>, vector<8x80xbf16>
    %c0_1 = arith.constant 0 : index
    %c0_2 = arith.constant 0 : index
    %1 = vector.load %arg2[%c0_1, %c0_2] : memref<80x128xbf16, #tpu.memory_space<vmem>>, vector<80x128xbf16>
    %cst = arith.constant dense<0.000000e+00> : vector<8x128xf32>
    %2 = tpu.matmul %0, %1, %cst {dimension_numbers = #tpu.dot_dimension_numbers<[1], [0], [0], [1], [0, 0, 1, 1], [], []>} : vector<8x80xbf16>, vector<80x128xbf16>, vector<8x128xf32> -> vector<8x128xf32>
    %c0_3 = arith.constant 0 : index
    %c0_4 = arith.constant 0 : index
    %3 = vector.load %arg3[%c0_3, %c0_4] : memref<1x128xf32, #tpu.memory_space<vmem>>, vector<1x128xf32>
    %4 = vector.broadcast %3 : vector<1x128xf32> to vector<8x128xf32>
    %5 = arith.addf %2, %4 : vector<8x128xf32>
    %cst_5 = arith.constant 0.000000e+00 : f32
    %6 = vector.broadcast %cst_5 : f32 to vector<8x128xf32>
    %7 = arith.maximumf %5, %6 : vector<8x128xf32>
    %8 = arith.truncf %7 : vector<8x128xf32> to vector<8x128xbf16>
    %c0_6 = arith.constant 0 : index
    %c0_7 = arith.constant 0 : index
    %9 = vector.load %arg4[%c0_6, %c0_7] : memref<128x256xbf16, #tpu.memory_space<vmem>>, vector<128x256xbf16>
    %cst_8 = arith.constant dense<0.000000e+00> : vector<8x256xf32>
    %10 = tpu.matmul %8, %9, %cst_8 {dimension_numbers = #tpu.dot_dimension_numbers<[1], [0], [0], [1], [0, 0, 1, 1], [], []>} : vector<8x128xbf16>, vector<128x256xbf16>, vector<8x256xf32> -> vector<8x256xf32>
    %c0_9 = arith.constant 0 : index
    %c0_10 = arith.constant 0 : index
    %11 = vector.load %arg5[%c0_9, %c0_10] : memref<1x256xf32, #tpu.memory_space<vmem>>, vector<1x256xf32>
    %12 = vector.broadcast %11 : vector<1x256xf32> to vector<8x256xf32>
    %13 = arith.addf %10, %12 : vector<8x256xf32>
    %cst_11 = arith.constant 0.000000e+00 : f32
    %14 = vector.broadcast %cst_11 : f32 to vector<8x256xf32>
    %15 = arith.maximumf %13, %14 : vector<8x256xf32>
    %16 = arith.truncf %15 : vector<8x256xf32> to vector<8x256xbf16>
    %c0_12 = arith.constant 0 : index
    %c0_13 = arith.constant 0 : index
    %17 = vector.load %arg6[%c0_12, %c0_13] : memref<8x256xbf16, #tpu.memory_space<vmem>>, vector<8x256xbf16>
    tpu.vector_store %arg6[%c0_12, %c0_13], %16 {strides = array<i32>} : memref<8x256xbf16, #tpu.memory_space<vmem>>, vector<8x256xbf16>,
    return
  }
  func.func @transform_0(%arg0: i32) -> (i32, i32) {
    %c0_i32 = arith.constant 0 : i32
    %c0_i32_0 = arith.constant 0 : i32
    return %arg0, %c0_i32 : i32, i32
  }
  func.func @transform_1(%arg0: i32) -> (i32, i32) {
    %c0_i32 = arith.constant 0 : i32
    %c0_i32_0 = arith.constant 0 : i32
    %c0_i32_1 = arith.constant 0 : i32
    return %c0_i32, %c0_i32_0 : i32, i32
  }
  func.func @transform_2(%arg0: i32) -> (i32, i32) {
    %c0_i32 = arith.constant 0 : i32
    %c0_i32_0 = arith.constant 0 : i32
    %c0_i32_1 = arith.constant 0 : i32
    return %c0_i32, %c0_i32_0 : i32, i32
  }
  func.func @transform_3(%arg0: i32) -> (i32, i32) {
    %c0_i32 = arith.constant 0 : i32
    %c0_i32_0 = arith.constant 0 : i32
    %c0_i32_1 = arith.constant 0 : i32
    return %c0_i32, %c0_i32_0 : i32, i32
  }
  func.func @transform_4(%arg0: i32) -> (i32, i32) {
    %c0_i32 = arith.constant 0 : i32
    %c0_i32_0 = arith.constant 0 : i32
    %c0_i32_1 = arith.constant 0 : i32
    return %c0_i32, %c0_i32_0 : i32, i32
  }
  func.func @transform_5(%arg0: i32) -> (i32, i32) {
    %c0_i32 = arith.constant 0 : i32
    %c0_i32_0 = arith.constant 0 : i32
    return %arg0, %c0_i32 : i32, i32
  }
}

</mosaic_0001>

<bundles_post_ra>
// kernel: tpu_custom_call.1
= control target key start
LH: loop header
LB: loop body
LE: loop exit
PB: predicated region body
PF: predicated region fallthrough
CT: control target
= control target key end

     0   :  { %10 = vsyncpa [#allocation3], 0  ;;  %s554_s0 = inlined_call_operand.hbm [shape: bf16[8,80], index: 0, kind: input, shape index: {}]   ;;  %s555_s1 = inlined_call_operand.hbm [shape: bf16[80,128], index: 1, kind: input, shape index: {}]   ;;  %s556_s2 = inlined_call_operand.vmem [shape: f32[1,128], index: 2, kind: input, shape index: {}]   ;;  %s557_s3 = inlined_call_operand.hbm [shape: bf16[128,256], index: 3, kind: input, shape index: {}]   ;;  %s558_s4 = inlined_call_operand.vmem [shape: f32[1,256], index: 4, kind: input, shape index: {}]   ;;  %s559_s5 = inlined_call_operand.hbm [shape: bf16[8,256], index: 5, kind: output, shape index: {}]  }
   0x1   :  { %11 = vsyncpa [#allocation6], 0  ;;  %s28_s20 = sshll.u32 %s555_s1, 4  ;;  %s29_s20 = int_to_ptr.hbm [resolvable:$true] %s28_s20 }
   0x2   :  { %12 = vsyncpa [#allocation4], 0  ;;  %s498_s21 = smov [#allocation5]   ;;  %s18_s25 = sshll.u32 %s554_s0, 4  ;;  %s19_s25 = int_to_ptr.hbm [resolvable:$true] %s18_s25 }
   0x3   :  { %s30_s22 = sshll.u32 %s498_s21, 4  ;;  %s499_s26 = smov 64   ;;  %s31_s22 = int_to_ptr.vmem [resolvable:$true] %s30_s22 }
   0x4   :  { %s500_s27 = smov 4   ;;  %s501_s28 = smov [#allocation2]  }
   0x5   :  { %36 = dma.hbm_to_vmem [thread:$0]  %s29_s20, 640, %s31_s22, [#allocation6], %s499_s26, %s499_s26, %s500_s27  }
   0x6   :  { %s20_s29 = sshll.u32 %s501_s28, 4  ;;  %s43_s7 = sshll.u32 %s557_s3, 4  ;;  %s21_s29 = int_to_ptr.vmem [resolvable:$true] %s20_s29  ;;  %s44_s7 = int_to_ptr.hbm [resolvable:$true] %s43_s7 }
   0x7   :  { %23 = dma.hbm_to_vmem [thread:$0]  %s19_s25, 64, %s21_s29, [#allocation3]  }
   0x8   :  { %s502_s1 = smov [#allocation7]   ;;  %s503_s9 = smov 128  }
   0x9   :  { %s45_s8 = sshll.u32 %s502_s1, 4  ;;  %s504_s10 = smov 8   ;;  %s46_s8 = int_to_ptr.vmem [resolvable:$true] %s45_s8 }
   0xa   :  { %51 = dma.hbm_to_vmem [thread:$0]  %s44_s7, 2048, %s46_s8, [#allocation6], %s503_s9, %s503_s9, %s504_s10  }
   0xb   :  { %492 = dma.done.wait [#allocation3], 64  }
   0xc   :  { %493 = vsyncadd [#allocation3], 4294967232 }
   0xd   :  { %494 = dma.done.wait [#allocation6], 2688  }
   0xe   :  { %495 = vsyncadd [#allocation6], 4294964608  ;;  %v370_v0 = vld [vmem:[#allocation5 + $0x20] sm:$0xff]  ;;  %v369_v1 = vld [vmem:[#allocation5 + $0x18] sm:$0xff]  ;;  %vm112_vm0 = vcmask 654336   ;;  %s505_s13 = smov [#allocation8]  }
   0xf   :  { %119 = vmatpush.bf16.msra.mxu0 %v370_v0  ;;  %v360_v2 = vld [vmem:[#allocation7 + $0x70] sm:$0xf]  ;;  %v386_v3 = vld [vmem:[#allocation7 + $0x74] sm:$0xf0]  ;;  %v385_v4 = vld [vmem:[#allocation7 + $0x74] sm:$0xf] }
  0x10   :  { %v361_v5 = vor.u32 %v386_v3, %v360_v2  ;;  %v362_v6 = vld [vmem:[#allocation7 + $0x78] sm:$0xf0]  ;;  %v352_v7 = vld [vmem:[#allocation7 + $0x60] sm:$0xf]  ;;  %v384_v8 = vld [vmem:[#allocation7 + $0x64] sm:$0xf0] }
  0x11   :  { %v365_v9 = vor.u32 %v385_v4, %v362_v6  ;;  %v383_v10 = vld [vmem:[#allocation7 + $0x64] sm:$0xf]  ;;  %v354_v11 = vld [vmem:[#allocation7 + $0x68] sm:$0xf0]  ;;  %v353_v12 = vor.u32 %v384_v8, %v352_v7  ;;  %v344_v15 = vld [vmem:[#allocation7 + $0x50] sm:$0xf] }
  0x12   :  { %233 = vmatpush.bf16.msra.mxu1 %v361_v5  ;;  %v368_v13 = vld [vmem:[#allocation5 + $0x10] sm:$0xff]  ;;  %v357_v14 = vor.u32 %v383_v10, %v354_v11  ;;  %v382_v16 = vld [vmem:[#allocation7 + $0x54] sm:$0xf0]  ;;  %v381_v17 = vld [vmem:[#allocation7 + $0x54] sm:$0xf]  ;;  %s270_s16 = sshll.u32 %s559_s5, 4  ;;  %s271_s16 = int_to_ptr.hbm [resolvable:$true] %s270_s16 }
  0x13   :  { %120 = vmatpush.bf16.msra.mxu0 %v369_v1  ;;  %246 = vmatpush.bf16.msra.mxu2 %v365_v9  ;;  %v346_v18 = vld [vmem:[#allocation7 + $0x58] sm:$0xf0]  ;;  %v367_v19 = vld [vmem:[#allocation5 + $0x8] sm:$0xff]  ;;  %v345_v20 = vor.u32 %v382_v16, %v344_v15  ;;  %v380_v23 = vld [vmem:[#allocation7 + $0x44] sm:$0xf0] }
  0x14   :  { %v349_v21 = vor.u32 %v381_v17, %v346_v18  ;;  %v336_v22 = vld [vmem:[#allocation7 + $0x40] sm:$0xf]  ;;  %v379_v24 = vld [vmem:[#allocation7 + $0x44] sm:$0xf]  ;;  %v338_v25 = vld [vmem:[#allocation7 + $0x48] sm:$0xf0] }
  0x15   :  { %v337_v26 = vor.u32 %v380_v23, %v336_v22  ;;  %v366_v27 = vld [vmem:[#allocation5] sm:$0xff]  ;;  %v341_v28 = vor.u32 %v379_v24, %v338_v25  ;;  %v328_v29 = vld [vmem:[#allocation7 + $0x30] sm:$0xf]  ;;  %v377_v31 = vld [vmem:[#allocation7 + $0x34] sm:$0xf] }
  0x16   :  { %234 = vmatpush.bf16.msra.mxu1 %v353_v12  ;;  %v378_v30 = vld [vmem:[#allocation7 + $0x34] sm:$0xf0]  ;;  %v330_v32 = vld [vmem:[#allocation7 + $0x38] sm:$0xf0]  ;;  %v67_v34 = vld [vmem:[#allocation2] sm:$0xf] }
  0x17   :  { %121 = vmatpush.bf16.msra.mxu0 %v368_v13  ;;  %247 = vmatpush.bf16.msra.mxu2 %v357_v14  ;;  %v329_v33 = vor.u32 %v378_v30, %v328_v29  ;;  %v333_v35 = vor.u32 %v377_v31, %v330_v32  ;;  %v320_v36 = vld [vmem:[#allocation7 + $0x20] sm:$0xf]  ;;  %v376_v37 = vld [vmem:[#allocation7 + $0x24] sm:$0xf0]  ;;  %v375_v38 = vld [vmem:[#allocation7 + $0x24] sm:$0xf] }
  0x18   :  { %v322_v39 = vld [vmem:[#allocation7 + $0x28] sm:$0xf0]  ;;  %v321_v40 = vor.u32 %v376_v37, %v320_v36  ;;  %v312_v42 = vld [vmem:[#allocation7 + $0x10] sm:$0xf]  ;;  %v374_v43 = vld [vmem:[#allocation7 + $0x14] sm:$0xf0] }
  0x19   :  { %v325_v41 = vor.u32 %v375_v38, %v322_v39  ;;  %v373_v44 = vld [vmem:[#allocation7 + $0x14] sm:$0xf]  ;;  %v313_v45 = vor.u32 %v374_v43, %v312_v42  ;;  %v314_v46 = vld [vmem:[#allocation7 + $0x18] sm:$0xf0]  ;;  %v304_v48 = vld [vmem:[#allocation7] sm:$0xf] }
  0x1a   :  { %235 = vmatpush.bf16.msra.mxu1 %v345_v20  ;;  %v317_v47 = vor.u32 %v373_v44, %v314_v46  ;;  %v372_v49 = vld [vmem:[#allocation7 + $0x4] sm:$0xf0]  ;;  %v371_v50 = vld [vmem:[#allocation7 + $0x4] sm:$0xf]  ;;  %v306_v52 = vld [vmem:[#allocation7 + $0x8] sm:$0xf0] }
  0x1b   :  { %122 = vmatpush.bf16.msra.mxu0 %v367_v19  ;;  %248 = vmatpush.bf16.msra.mxu2 %v349_v21  ;;  %v305_v51 = vor.u32 %v372_v49, %v304_v48  ;;  %v309_v53 = vor.u32 %v371_v50, %v306_v52  ;;  %v395_v54 = vld [vmem:[%s556_s2] ss:$0 sm:$0xff]  ;;  %s268_s2 = sshll.u32 %s505_s13, 4  ;;  %s269_s2 = int_to_ptr.vmem [resolvable:$true] %s268_s2 }
  0x1c   :  { %v147_v60 = vld [vmem:[%s558_s4] sm:$0x3] }
  0x1d   :  { %v149_v62 = vperm.slane %v147_v60, 0  ;;  %v150_v63 = vperm.slane %v147_v60, 1 }
  0x1e   :  { %236 = vmatpush.bf16.msra.mxu1 %v337_v26 }
  0x1f   :  { %123 = vmatpush.bf16.msra.mxu0 %v366_v27  ;;  %249 = vmatpush.bf16.msra.mxu2 %v341_v28 }
  0x22   :  { %301 = vmatmul.msk.bf16.vlgmr.msra.gmra.mxu0 %vm112_vm0, %v67_v34  ;;  %237 = vmatpush.bf16.msra.mxu1 %v329_v33 }
  0x23   :  { %250 = vmatpush.bf16.msra.mxu2 %v333_v35 }
  0x26   :  { %238 = vmatpush.bf16.msra.mxu1 %v321_v40 }
  0x27   :  { %251 = vmatpush.bf16.msra.mxu2 %v325_v41 }
  0x2a   :  { %239 = vmatpush.bf16.msra.mxu1 %v313_v45 }
  0x2b   :  { %252 = vmatpush.bf16.msra.mxu2 %v317_v47 }
  0x2e   :  { %240 = vmatpush.bf16.msra.mxu1 %v305_v51 }
  0x2f   :  { %253 = vmatpush.bf16.msra.mxu2 %v309_v53 }
  0x9f   :  { %v125_v55 = vpop.f32.mrf.mxu0 }
  0xa0   :  { %v126_v56 = vadd.f32 %v395_v54, %v125_v55 }
  0xa2   :  { %v129_v57 = vmax.f32 %v126_v56, 0.0 }
  0xa4   :  { %v130_v58 = vpack.c.bf16 %v129_v57, %v129_v57 }
  0xa6   :  { %241 = vmatmul.bf16.vlgmr.msra.gmra.mxu1 %v130_v58  ;;  %254 = vmatmul.bf16.vlgmr.msra.gmra.mxu2 %v130_v58 }
  0xa7   :  { %v127_v59 = vpop.f32.mrf.mxu0 }
 0x123   :  { %v242_v61 = vpop.f32.mrf.mxu1 }
 0x124   :  { %v243_v0 = vadd.f32 %v242_v61, %v149_v62 }
 0x126   :  { %v259_v4 = vmax.f32 %v243_v0, 0.0 }
 0x129   :  { %v255_v1 = vpop.f32.mrf.mxu2 }
 0x12a   :  { %v256_v2 = vadd.f32 %v255_v1, %v150_v63 }
 0x12b   :  { %v244_v3 = vpop.f32.mrf.mxu1 }
 0x12c   :  { %v260_v5 = vmax.f32 %v256_v2, 0.0 }
 0x12e   :  { %v261_v6 = vpack.c.bf16 %v260_v5, %v259_v4 }
 0x130   :  { %262 = vst [vmem:[#allocation8] sm:$0xff] %v261_v6 }
 0x131   :  { %v257_v7 = vpop.f32.mrf.mxu2  ;;  %273 = dma.vmem_to_hbm [thread:$0]  %s269_s2, 128, %s271_s16, [#allocation4]  }
 0x132   :  { %496 = dma.done.wait [#allocation4], 128  }
 0x133   :  { %497 = vsyncadd [#allocation4], 4294967168 }
 0x134   :  { %278 = vsyncpa [#allocation3], 1 }
 0x135   :  { %279 = vsyncpa [#allocation6], 1 }
 0x136   :  { %280 = vsyncpa [#allocation4], 1 }

</bundles_post_ra>
